<compile_context>
chip_gen: v5e
topology: v5e:2x2
jax: 0.10.0
libtpu: 0.0.40
codegen_flags: <defaults>
</compile_context>

<pallas_src>
import functools
import math

import jax
import jax.numpy as jnp
from jax import lax
from jax.experimental import pallas as pl
from jax.experimental.pallas import tpu as pltpu


def _pick_tile(n, cap):
    """Largest tile <= cap that divides n and keeps (8,128) legality."""
    if n <= cap:
        return n
    for t in range(cap, 7, -1):
        if n % t == 0 and t % 8 == 0:
            return t
    return n  # fall back to the full axis (block == full dim is always legal)


# ---------------------------------------------------------------------------
# Kernel 1: fused QKV projection  (B*T, C) @ (C, 3H) -> (B*T, 3H)
# ---------------------------------------------------------------------------
def _qkv_proj_kernel(x_ref, w_ref, qkv_ref):
    qkv_ref[...] = jnp.dot(
        x_ref[...], w_ref[...], preferred_element_type=jnp.float32
    ).astype(qkv_ref.dtype)


def _qkv_projection(x2d, wqkv, *, row_tile):
    BT, C = x2d.shape
    H3 = wqkv.shape[1]
    cost = pl.CostEstimate(
        flops=2 * BT * C * H3,
        transcendentals=0,
        bytes_accessed=int(x2d.size * 2 + wqkv.size * 2 + BT * H3 * 2))
    return pl.pallas_call(
        _qkv_proj_kernel,
        out_shape=jax.ShapeDtypeStruct((BT, H3), jnp.bfloat16),
        grid_spec=pltpu.PrefetchScalarGridSpec(
            num_scalar_prefetch=0,
            grid=(BT // row_tile,),
            in_specs=[
                pl.BlockSpec((row_tile, C), lambda i: (i, 0)),
                pl.BlockSpec((C, H3), lambda i: (0, 0)),
            ],
            out_specs=pl.BlockSpec((row_tile, H3), lambda i: (i, 0)),
        ),
        compiler_params=pltpu.CompilerParams(
            dimension_semantics=("parallel",),
            vmem_limit_bytes=32 * 1024 * 1024),
        cost_estimate=cost,
    )(x2d, wqkv)


# ---------------------------------------------------------------------------
# Kernel 2: flash-style attention with online softmax + causal block skipping
# ---------------------------------------------------------------------------
def _flash_attn_kernel(q_ref, k_ref, v_ref, o_ref, m_sc, l_sc, acc_sc, *,
                       masked, tq, tk):
    qi = pl.program_id(1)
    ki = pl.program_id(2)
    nk = pl.num_programs(2)

    @pl.when(ki == 0)
    def _init():
        m_sc[...] = jnp.full(m_sc.shape, -jnp.inf, jnp.float32)
        l_sc[...] = jnp.zeros(l_sc.shape, jnp.float32)
        acc_sc[...] = jnp.zeros(acc_sc.shape, jnp.float32)

    def _block():
        # (bb, tq, tk) scores for this tile only -- never the full (T, T).
        s = jnp.einsum("bqd,bkd->bqk", q_ref[...], k_ref[...],
                       preferred_element_type=jnp.float32)
        if masked:
            # per-tile 2-D mask, broadcast over the batch block
            row = qi * tq + lax.broadcasted_iota(jnp.int32, (tq, tk), 0)
            col = ki * tk + lax.broadcasted_iota(jnp.int32, (tq, tk), 1)
            s = jnp.where((col <= row)[None, :, :], s, -1e30)
        m_prev = m_sc[...]
        m_new = jnp.maximum(m_prev, s.max(axis=-1, keepdims=True))
        alpha = jnp.exp(m_prev - m_new)
        p = jnp.exp(s - m_new)
        l_sc[...] = alpha * l_sc[...] + p.sum(axis=-1, keepdims=True)
        acc_sc[...] = alpha * acc_sc[...] + jnp.einsum(
            "bqk,bkd->bqd", p.astype(v_ref.dtype), v_ref[...],
            preferred_element_type=jnp.float32)
        m_sc[...] = m_new

    if masked:
        # skip kv blocks that lie entirely above the causal diagonal
        @pl.when(ki * tk <= qi * tq + (tq - 1))
        def _():
            _block()
    else:
        _block()

    @pl.when(ki == nk - 1)
    def _finalize():
        o_ref[...] = (acc_sc[...] *
                      pl.reciprocal(l_sc[...], approx=True)).astype(o_ref.dtype)


def _flash_attention(q, k, v, *, masked, batch_block, q_tile, kv_tile,
                     out_dtype):
    B, T, H = q.shape
    bb, tq, tk = batch_block, q_tile, kv_tile
    kernel = functools.partial(_flash_attn_kernel, masked=masked, tq=tq, tk=tk)

    mask_factor = 0.5 if masked else 1.0
    cost = pl.CostEstimate(
        flops=int(mask_factor * 4 * B * T * T * H),
        transcendentals=int(mask_factor * B * T * T) + B * T,
        bytes_accessed=int((q.size + k.size + v.size) * 2 + B * T * H * 4))

    # Explicit VMEM budget: double-buffered bf16 input blocks + f32 output
    # block + scratch + f32 score/prob temps; clamped well under the v7x
    # 64 MiB physical ceiling (and the v5e 16 MiB scoped default is raised).
    vmem_est = (2 * 2 * (bb * tq * H + 2 * bb * tk * H)   # q,k,v bf16 x2 bufs
                + 2 * 4 * bb * tq * H                     # output f32 x2 bufs
                + 4 * (2 * bb * tq + bb * tq * H)         # m, l, acc scratch
                + 4 * 4 * bb * tq * tk)                   # s/p/mask f32 temps
    vmem_limit = int(min(max(4 * vmem_est, 16 * 2**20), 48 * 2**20))

    return pl.pallas_call(
        kernel,
        out_shape=jax.ShapeDtypeStruct((B, T, H), out_dtype),
        grid_spec=pltpu.PrefetchScalarGridSpec(
            num_scalar_prefetch=0,
            grid=(B // bb, T // tq, T // tk),
            in_specs=[
                pl.BlockSpec((bb, tq, H), lambda b, i, j: (b, i, 0)),
                pl.BlockSpec((bb, tk, H), lambda b, i, j: (b, j, 0)),
                pl.BlockSpec((bb, tk, H), lambda b, i, j: (b, j, 0)),
            ],
            out_specs=pl.BlockSpec((bb, tq, H), lambda b, i, j: (b, i, 0)),
            scratch_shapes=[
                pltpu.VMEM((bb, tq, 1), jnp.float32),   # running max
                pltpu.VMEM((bb, tq, 1), jnp.float32),   # running denom
                pltpu.VMEM((bb, tq, H), jnp.float32),   # output accumulator
            ],
        ),
        compiler_params=pltpu.CompilerParams(
            dimension_semantics=("parallel", "parallel", "arbitrary"),
            vmem_limit_bytes=vmem_limit),
        cost_estimate=cost,
    )(q, k, v)


# ---------------------------------------------------------------------------
# Wrapper: PyTorch `Head.forward` (eval mode)
# ---------------------------------------------------------------------------
def head_forward(x, wq, wk, wv, *, masked=True, batch_block=1,
                 q_tile=None, kv_tile=None):
    """x: (B, T, C) f32;  wq/wk/wv: (C, H) f32 (== Linear.weight.T)."""
    B, T, C = x.shape
    H = wq.shape[1]
    assert B % batch_block == 0, "batch_block must divide B"

    # Fold the 1/sqrt(C) scale into Wq, fuse the three projections into one
    # lane-wider (C, 3H) operand, and pre-cast both operands to bf16 in the
    # wrapper so the kernel DMAs half the bytes (f32 MXU accumulation).
    scale = 1.0 / math.sqrt(C)
    wqkv = jnp.concatenate([wq * scale, wk, wv], axis=1).astype(jnp.bfloat16)
    x2d = x.reshape(B * T, C).astype(jnp.bfloat16)

    row_tile = _pick_tile(B * T, 512)
    qkv2d = _qkv_projection(x2d, wqkv, row_tile=row_tile)      # (B*T, 3H) bf16

    # split in the wrapper (plain XLA slices) -> no in-kernel lane slicing
    qkv = qkv2d.reshape(B, T, 3 * H)
    q = qkv[:, :, :H]
    k = qkv[:, :, H:2 * H]
    v = qkv[:, :, 2 * H:]

    tq = _pick_tile(T, 256) if q_tile is None else q_tile
    tk = _pick_tile(T, 256) if kv_tile is None else kv_tile

    return _flash_attention(q, k, v, masked=masked, batch_block=batch_block,
                            q_tile=tq, kv_tile=tk, out_dtype=x.dtype)


def head_reference(x, wq, wk, wv, *, masked=True):
    """Pure-JAX reference mirroring the PyTorch module (eval mode)."""
    B, T, C = x.shape
    q = x @ wq
    k = x @ wk
    v = x @ wv
    wei = jnp.einsum("btd,bsd->bts", q, k) / math.sqrt(C)
    if masked:
        tril = jnp.tril(jnp.ones((T, T)))
        wei = jnp.where(tril == 0, -jnp.inf, wei)
    wei = jax.nn.softmax(wei, axis=-1)
    return wei @ v


if __name__ == "__main__":
    # Module hyperparameters (synthetic, deterministic init)
    batch = 2
    block_size = 8          # == T (sequence length)
    d_model = 32
    head_size = 16

    key = jax.random.PRNGKey(0)
    kx, kq, kk, kv = jax.random.split(key, 4)
    x = jax.random.normal(kx, (batch, block_size, d_model), dtype=jnp.float32)
    wq = jax.random.normal(kq, (d_model, head_size), dtype=jnp.float32) * 0.02
    wk = jax.random.normal(kk, (d_model, head_size), dtype=jnp.float32) * 0.02
    wv = jax.random.normal(kv, (d_model, head_size), dtype=jnp.float32) * 0.02

    # masked (causal) path
    out = jax.block_until_ready(head_forward(x, wq, wk, wv, masked=True))
    ref = head_reference(x, wq, wk, wv, masked=True)
    assert out.shape == (batch, block_size, head_size)
    max_diff = float(jnp.max(jnp.abs(out - ref)))
    assert jnp.allclose(out, ref, atol=2e-2, rtol=2e-2), (
        f"masked mismatch vs reference, max abs diff={max_diff}")

    # unmasked path
    out_u = jax.block_until_ready(head_forward(x, wq, wk, wv, masked=False))
    ref_u = head_reference(x, wq, wk, wv, masked=False)
    max_diff_u = float(jnp.max(jnp.abs(out_u - ref_u)))
    assert jnp.allclose(out_u, ref_u, atol=2e-2, rtol=2e-2), (
        f"unmasked mismatch vs reference, max abs diff={max_diff_u}")

    print("KERNEL_OK")
</pallas_src>

<mosaic_0001>
module attributes {stable_mosaic.version = 11 : i64} {
  func.func @_qkv_proj_kernel(%arg0: i32, %arg1: memref<16x32xbf16, #tpu.memory_space<vmem>>, %arg2: memref<32x48xbf16, #tpu.memory_space<vmem>>, %arg3: memref<16x48xbf16, #tpu.memory_space<vmem>>) attributes {dimension_semantics = [#tpu.dimension_semantics<parallel>], iteration_bounds = array<i64: 1>, scalar_prefetch = 0 : i64, scratch_operands = 0 : i64, tpu.core_type = #tpu.core_type<tc>, window_params = [{transform_indices = @transform_0, window_bounds = array<i64: 16, 32>}, {pipeline_mode = #tpu.pipeline_mode<synchronous>, transform_indices = @transform_1, window_bounds = array<i64: 32, 48>}, {transform_indices = @transform_2, window_bounds = array<i64: 16, 48>}]} {
    %c0 = arith.constant 0 : index
    %c0_0 = arith.constant 0 : index
    %0 = vector.load %arg1[%c0, %c0_0] : memref<16x32xbf16, #tpu.memory_space<vmem>>, vector<16x32xbf16>
    %c0_1 = arith.constant 0 : index
    %c0_2 = arith.constant 0 : index
    %1 = vector.load %arg2[%c0_1, %c0_2] : memref<32x48xbf16, #tpu.memory_space<vmem>>, vector<32x48xbf16>
    %cst = arith.constant dense<0.000000e+00> : vector<16x48xf32>
    %2 = tpu.matmul %0, %1, %cst {dimension_numbers = #tpu.dot_dimension_numbers<[1], [0], [0], [1], [0, 0, 1, 1], [], []>} : vector<16x32xbf16>, vector<32x48xbf16>, vector<16x48xf32> -> vector<16x48xf32>
    %3 = arith.truncf %2 : vector<16x48xf32> to vector<16x48xbf16>
    %c0_3 = arith.constant 0 : index
    %c0_4 = arith.constant 0 : index
    %4 = vector.load %arg3[%c0_3, %c0_4] : memref<16x48xbf16, #tpu.memory_space<vmem>>, vector<16x48xbf16>
    tpu.vector_store %arg3[%c0_3, %c0_4], %3 {strides = array<i32>} : memref<16x48xbf16, #tpu.memory_space<vmem>>, vector<16x48xbf16>,
    return
  }
  func.func @transform_0(%arg0: i32) -> (i32, i32) {
    %c0_i32 = arith.constant 0 : i32
    %c0_i32_0 = arith.constant 0 : i32
    return %arg0, %c0_i32 : i32, i32
  }
  func.func @transform_1(%arg0: i32) -> (i32, i32) {
    %c0_i32 = arith.constant 0 : i32
    %c0_i32_0 = arith.constant 0 : i32
    %c0_i32_1 = arith.constant 0 : i32
    return %c0_i32, %c0_i32_0 : i32, i32
  }
  func.func @transform_2(%arg0: i32) -> (i32, i32) {
    %c0_i32 = arith.constant 0 : i32
    %c0_i32_0 = arith.constant 0 : i32
    return %arg0, %c0_i32 : i32, i32
  }
}

</mosaic_0001>

<bundles_post_ra>
// kernel: tpu_custom_call.1
= control target key start
LH: loop header
LB: loop body
LE: loop exit
PB: predicated region body
PF: predicated region fallthrough
CT: control target
= control target key end

     0   :  { %7 = vsyncpa [#allocation3], 0  ;;  %s248_s0 = inlined_call_operand.hbm [shape: bf16[16,32], index: 0, kind: input, shape index: {}]   ;;  %s249_s1 = inlined_call_operand.hbm [shape: bf16[32,48], index: 1, kind: input, shape index: {}]   ;;  %s250_s2 = inlined_call_operand.hbm [shape: bf16[16,48], index: 2, kind: output, shape index: {}]  }
   0x1   :  { %8 = vsyncpa [#allocation6], 0 }
   0x2   :  { %9 = vsyncpa [#allocation4], 0  ;;  %s14_s11 = sshll.u32 %s248_s0, 4  ;;  %s210_s12 = smov [#allocation2]   ;;  %s15_s11 = int_to_ptr.hbm [resolvable:$true] %s14_s11 }
   0x3   :  { %s16_s13 = sshll.u32 %s210_s12, 4  ;;  %s27_s16 = sshll.u32 %s249_s1, 4  ;;  %s17_s13 = int_to_ptr.vmem [resolvable:$true] %s16_s13  ;;  %s28_s16 = int_to_ptr.hbm [resolvable:$true] %s27_s16 }
   0x4   :  { %s211_s17 = smov 64   ;;  %s212_s18 = smov 4  }
   0x5   :  { %22 = dma.hbm_to_vmem [thread:$0]  %s15_s11, 128, %s17_s13, [#allocation3], %s211_s17, %s211_s17, %s212_s18  }
   0x6   :  { %s213_s19 = smov [#allocation5]  }
   0x7   :  { %s29_s20 = sshll.u32 %s213_s19, 4  ;;  %s30_s20 = int_to_ptr.vmem [resolvable:$true] %s29_s20 }
   0x8   :  { %35 = dma.hbm_to_vmem [thread:$0]  %s28_s16, 256, %s30_s20, [#allocation6], %s211_s17, %s211_s17, %s212_s18  }
   0x9   :  { %204 = dma.done.wait [#allocation3], 128  }
   0xa   :  { %205 = vsyncadd [#allocation3], 4294967168 }
   0xb   :  { %206 = dma.done.wait [#allocation6], 256  }
   0xc   :  { %207 = vsyncadd [#allocation6], 4294967040  ;;  %v126_v0 = vld [vmem:[#allocation5 + $0x8] sm:$0xff]  ;;  %v125_v1 = vld [vmem:[#allocation5] sm:$0xff]  ;;  %vm68_vm0 = vcmask 261120   ;;  %vm88_vm1 = vcmask 388096  }
   0xd   :  { %78 = vmatpush.bf16.msra.mxu0 %v126_v0  ;;  %v124_v2 = vld [vmem:[#allocation2] sm:$0xff]  ;;  %s214_s0 = smov [#allocation7]   ;;  %s97_s23 = sshll.u32 %s250_s2, 4  ;;  %s98_s23 = int_to_ptr.hbm [resolvable:$true] %s97_s23 }
   0xe   :  { %s95_s1 = sshll.u32 %s214_s0, 4  ;;  %s96_s1 = int_to_ptr.vmem [resolvable:$true] %s95_s1 }
  0x11   :  { %79 = vmatpush.bf16.msra.mxu0 %v125_v1 }
  0x14   :  { %123 = vmatmul.msk.bf16.vlgmr.msra.gmra.mxu0 %vm68_vm0, %v124_v2 }
  0x91   :  { %v81_v3 = vpop.f32.mrf.mxu0 }
  0x92   :  { %v86_v4 = vpack.c.bf16 %v81_v3, %v81_v3 }
  0x94   :  { %89 = vst.msk [vmem:[#allocation7] sm:$0xf] %vm88_vm1, %v86_v4 }
  0x99   :  { %v83_v5 = vpop.f32.mrf.mxu0 }
  0x9a   :  { %v87_v6 = vpack.c.bf16 %v83_v5, %v83_v5 }
  0x9c   :  { %90 = vst.msk [vmem:[#allocation7 + $0x4] sm:$0xf] %vm88_vm1, %v87_v6 }
  0x9d   :  { %103 = dma.vmem_to_hbm [thread:$0]  %s96_s1, 128, %s98_s23, [#allocation4], %s211_s17, %s211_s17, %s212_s18  }
  0x9e   :  { %208 = dma.done.wait [#allocation4], 128  }
  0x9f   :  { %209 = vsyncadd [#allocation4], 4294967168 }
  0xa0   :  { %108 = vsyncpa [#allocation3], 1 }
  0xa1   :  { %109 = vsyncpa [#allocation6], 1 }
  0xa2   :  { %110 = vsyncpa [#allocation4], 1 }

</bundles_post_ra>
